<compile_context>
chip_gen: v7x
topology: tpu7x:2x2x1
jax: 0.10.0
libtpu: 0.0.40
codegen_flags: <defaults>
</compile_context>

<pallas_src>
import functools

import jax
import jax.numpy as jnp
from jax import lax
from jax.experimental import pallas as pl
from jax.experimental.pallas import tpu as pltpu

SMOOTH = 1e-5
EPS = 1e-8
_LABEL_BITS = 16
_LABEL_MASK = (1 << _LABEL_BITS) - 1


def _dc_ce_kernel(x_ref, enc_ref, stats_ref, ce_ref,
                  tp_acc, sp_acc, sy_acc, ce_acc,
                  *, n_lanes, tile_n, num_channels, pack):
    C = num_channels
    k = pack
    R = C * k
    b = pl.program_id(0)
    n = pl.program_id(1)

    @pl.when(jnp.logical_and(b == 0, n == 0))
    def _init():
        tp_acc[...] = jnp.zeros_like(tp_acc)
        sp_acc[...] = jnp.zeros_like(sp_acc)
        sy_acc[...] = jnp.zeros_like(sy_acc)
        ce_acc[...] = jnp.zeros_like(ce_acc)

    start = n * tile_n

    def _chan_reduce(v, binop, reduce_fn):
        # Per-(sub-row, lane) reduction over the C channels.
        #  k == 1 : plain sublane reduce, returns (1, TN) (broadcasts later).
        #  k  > 1 : roll-based tree (C is a power of two, R == 8); returns
        #           (R, TN) with the result broadcast to every row.
        if k == 1:
            return reduce_fn(v, axis=0, keepdims=True)
        out = v
        step = (C // 2) * k
        while step >= k:
            out = binop(out, pltpu.roll(out, shift=step, axis=0))
            step //= 2
        return out

    def _accumulate(masked):
        x = x_ref[...].astype(jnp.float32)                  # (R, TN) logits
        enc = enc_ref[...]                                  # (k, TN) int32
        if k == 1:
            enc_b = enc                                     # (1, TN)
        else:
            enc_b = jnp.concatenate([enc] * C, axis=0)      # (R, TN)
        labels = jnp.bitwise_and(enc_b, _LABEL_MASK)
        dice_m = jnp.right_shift(enc_b, _LABEL_BITS).astype(jnp.float32)

        if masked:
            lane = lax.broadcasted_iota(jnp.int32, (1, tile_n), 1)
            valid = (start + lane) < n_lanes                # (1, TN)
            # selects (not multiplies): stale data in the uncovered part of a
            # partial block must not poison the sums with inf/nan.
            x = jnp.where(valid, x, 0.0)
            m_b = jnp.where(valid, dice_m, 0.0)
        else:
            valid = None
            m_b = dice_m

        # ---- fused softmax over channels ----
        xmax = _chan_reduce(x, jnp.maximum, jnp.max)
        xs = x - xmax
        e = jnp.exp(xs)
        s = _chan_reduce(e, jnp.add, jnp.sum)
        r = pl.reciprocal(s, approx=True)                   # EUP path
        r = r * (2.0 - s * r)                               # one Newton step
        p = e * r                                           # probabilities

        # ---- select-based one-hot ----
        row = lax.broadcasted_iota(jnp.int32, (R, tile_n), 0)
        cls = row if k == 1 else jnp.right_shift(row, k.bit_length() - 1)
        sel = labels == cls                                 # (R, TN) bool

        mp = p * m_b
        tp_acc[...] += jnp.sum(jnp.where(sel, mp, 0.0), axis=-1, keepdims=True)
        sp_acc[...] += jnp.sum(mp, axis=-1, keepdims=True)
        sy_acc[...] += jnp.sum(jnp.where(sel, m_b, 0.0), axis=-1, keepdims=True)

        # ---- cross-entropy: log(sum exp(xs)) - xs[label] ----
        xst = _chan_reduce(jnp.where(sel, xs, 0.0), jnp.add, jnp.sum)
        if k > 1:
            xst = xst[0:k, :]
            s_small = s[0:k, :]
        else:
            s_small = s
        ce_t = jnp.log(s_small) - xst                       # (k, TN)
        if masked:
            ce_t = jnp.where(valid, ce_t, 0.0)
        ce_row = jnp.sum(ce_t, axis=-1, keepdims=True)      # (k, 1)
        ce_acc[...] += jnp.sum(ce_row, axis=0, keepdims=True)

    is_tail = (start + tile_n) > n_lanes

    @pl.when(jnp.logical_not(is_tail))
    def _interior():                                        # unmasked fast path
        _accumulate(False)

    @pl.when(is_tail)
    def _tail():                                            # ragged tail
        _accumulate(True)

    @pl.when(jnp.logical_and(b == pl.num_programs(0) - 1,
                             n == pl.num_programs(1) - 1))
    def _finalize():
        stats_ref[:, 0:1] = tp_acc[...]
        stats_ref[:, 1:2] = sp_acc[...]
        stats_ref[:, 2:3] = sy_acc[...]
        ce_ref[...] = ce_acc[...]


def _pick_tile_n(num_rows, pack, n_lanes, itemsize):
    # Double-buffered input blocks plus an allowance (~14 live (R, TN) f32
    # arrays) for the element-wise chain's temporaries; kept well under the
    # smallest per-core budget (v7x: 64 MiB physical, 32 MiB default scoped).
    per_lane = 2 * (num_rows * itemsize + pack * 4) + 14 * num_rows * 4
    budget = 24 * 1024 * 1024
    t = budget // per_lane
    t = max(512, min(32768, t))
    t = (t // 128) * 128
    lanes_pad = ((n_lanes + 127) // 128) * 128
    return max(128, min(t, lanes_pad))


@functools.partial(jax.jit, static_argnames=(
    "ignore_edge_kernel_size", "weight_ce", "weight_dice", "log_dice",
    "ignore_label", "tile_n", "use_sublane_packing"))
def dc_and_ce_ignore_edge_loss(net_output, target, flags, *,
                               ignore_edge_kernel_size=3,
                               weight_ce=1.0, weight_dice=1.0,
                               log_dice=False, ignore_label=None,
                               tile_n=None, use_sublane_packing=True):
    """net_output: (B, C, D, H, W) logits; target: (B, 1, D, H, W) int labels;
    flags: (B,) ints (flag==0 -> dice mask forced to 1 for that batch element)."""
    if ignore_label is not None:
        # TODO(synk): ignore_label path not implemented.
        raise NotImplementedError("ignore_label is not supported")

    B, C, D, H, W = net_output.shape
    n_spatial = D * H * W
    ek = ignore_edge_kernel_size

    tgt = target.astype(jnp.int32)                           # (B, 1, D, H, W)

    # --- edge-ignore mask + label packed into one int32 stream (fused expr) ---
    fg = (tgt > 0).astype(jnp.float32)
    dilated = lax.reduce_window(fg, 0.0, lax.add,
                                (1, 1, ek, ek, ek), (1, 1, 1, 1, 1), "SAME")
    boundary = jnp.logical_and(dilated > 0.0, dilated < float(ek ** 3))
    keep = jnp.logical_or(jnp.logical_not(boundary),
                          (flags == 0).reshape(B, 1, 1, 1, 1))
    enc = jnp.bitwise_or(tgt, jnp.left_shift(keep.astype(jnp.int32),
                                             _LABEL_BITS))   # (B, 1, D, H, W)

    # --- sublane packing factor: fold spatial into channels up to 8 rows ---
    pack = 1
    if use_sublane_packing and C < 8 and 8 % C == 0 and n_spatial % (8 // C) == 0:
        pack = 8 // C
    R = C * pack
    n_lanes = n_spatial // pack

    x3 = net_output.reshape(B, R, n_lanes)                   # free reshape
    enc3 = enc.reshape(B, pack, n_lanes)                     # free reshape

    if tile_n is None:
        tile_n = _pick_tile_n(R, pack, n_lanes, net_output.dtype.itemsize)
    assert tile_n % 128 == 0, "tile_n must be a multiple of 128"
    n_tiles = (n_lanes + tile_n - 1) // tile_n

    in_block_bytes = (R * net_output.dtype.itemsize + pack * 4) * tile_n
    vmem_bytes = int(min(40 * 1024 * 1024,
                         max(32 * 1024 * 1024,
                             2 * in_block_bytes + 14 * R * 4 * tile_n
                             + 2 * 1024 * 1024)))

    kern = functools.partial(_dc_ce_kernel, n_lanes=n_lanes, tile_n=tile_n,
                             num_channels=C, pack=pack)

    stats, ce_sum = pl.pallas_call(
        kern,
        out_shape=(jax.ShapeDtypeStruct((R, 3), jnp.float32),
                   jax.ShapeDtypeStruct((1, 1), jnp.float32)),
        grid_spec=pltpu.PrefetchScalarGridSpec(
            num_scalar_prefetch=0,
            grid=(B, n_tiles),
            in_specs=[
                pl.BlockSpec((None, R, tile_n), lambda b, n: (b, 0, n)),
                pl.BlockSpec((None, pack, tile_n), lambda b, n: (b, 0, n)),
            ],
            out_specs=(
                pl.BlockSpec((R, 3), lambda b, n: (0, 0)),
                pl.BlockSpec((1, 1), lambda b, n: (0, 0)),
            ),
            scratch_shapes=[
                pltpu.VMEM((R, 1), jnp.float32),
                pltpu.VMEM((R, 1), jnp.float32),
                pltpu.VMEM((R, 1), jnp.float32),
                pltpu.VMEM((1, 1), jnp.float32),
            ],
        ),
        compiler_params=pltpu.CompilerParams(
            # TODO(synk): on v7x add a leading CORE_PARALLEL axis (or core_map)
            # to engage the 2nd TensorCore; omitted so v5e/v6e pay no split cost.
            dimension_semantics=("arbitrary", "arbitrary"),
            vmem_limit_bytes=vmem_bytes,
        ),
        cost_estimate=pl.CostEstimate(
            flops=int(20 * B * C * n_spatial),
            transcendentals=int(B * (C + 2) * n_spatial),
            bytes_accessed=int(B * n_spatial *
                               (C * net_output.dtype.itemsize + 4)
                               + (R * 3 + 1) * 4),
        ),
    )(x3, enc3)

    # combine sub-row partials; fp = sp - tp, fn = sy - tp => 2tp+fp+fn = sp+sy
    tp = jnp.sum(stats[:, 0].reshape(C, pack), axis=1)
    sp = jnp.sum(stats[:, 1].reshape(C, pack), axis=1)
    sy = jnp.sum(stats[:, 2].reshape(C, pack), axis=1)
    dc = (2.0 * tp + SMOOTH) / (sp + sy + SMOOTH + EPS)
    dc_loss = -jnp.mean(dc[1:])                       # batch_dice=True, do_bg=False
    if log_dice:
        dc_loss = -jnp.log(-dc_loss)
    ce_loss = ce_sum[0, 0] / float(B * n_spatial)
    return weight_ce * ce_loss + weight_dice * dc_loss


def _reference_loss(net_output, target, flags, k=3):
    """Pure-JAX mirror of the PyTorch module (ignore_label=None, defaults)."""
    B, C, D, H, W = net_output.shape
    tgt = target.astype(jnp.int32)
    fg = (tgt > 0).astype(jnp.float32)
    dilated = lax.reduce_window(fg, 0.0, lax.add,
                                (1, 1, k, k, k), (1, 1, 1, 1, 1), "SAME")
    boundary = jnp.logical_and(dilated > 0, dilated < float(k ** 3))
    mask = jnp.where(boundary, 0.0, 1.0)
    mask = jnp.where((flags == 0).reshape(B, 1, 1, 1, 1), 1.0, mask)

    p = jax.nn.softmax(net_output.astype(jnp.float32), axis=1)
    yoh = jax.nn.one_hot(tgt[:, 0], C, axis=1, dtype=jnp.float32)
    axes = (0, 2, 3, 4)
    tp = jnp.sum(p * yoh * mask, axis=axes)
    fp = jnp.sum(p * (1.0 - yoh) * mask, axis=axes)
    fn = jnp.sum((1.0 - p) * yoh * mask, axis=axes)
    dc = (2.0 * tp + SMOOTH) / (2.0 * tp + fp + fn + SMOOTH + EPS)
    dc_loss = -jnp.mean(dc[1:])

    logp = jax.nn.log_softmax(net_output.astype(jnp.float32), axis=1)
    ce = -jnp.take_along_axis(logp, tgt, axis=1)[:, 0]
    ce_loss = jnp.mean(ce)
    return ce_loss + dc_loss


if __name__ == "__main__":
    key = jax.random.PRNGKey(0)
    kx, ky = jax.random.split(key)

    # --- main case: exercises the packed (C=4 -> 8-sublane) path ---
    B, C, D, H, W = 2, 4, 7, 12, 20            # DHW = 1680 -> ragged tail
    net_output = jax.random.normal(kx, (B, C, D, H, W), dtype=jnp.float32)
    target = jax.random.randint(ky, (B, 1, D, H, W), 0, C, dtype=jnp.int32)
    flags = jnp.array([0, 1], dtype=jnp.int32)
    ref = _reference_loss(net_output, target, flags, k=3)

    # default (auto) tile: single partial tile per batch element
    out = jax.block_until_ready(
        dc_and_ce_ignore_edge_loss(net_output, target, flags))
    assert jnp.allclose(out, ref, atol=1e-3, rtol=1e-3), (out, ref)

    # forced small tile: interior fast-path tiles + ragged tail tile
    out_small = jax.block_until_ready(
        dc_and_ce_ignore_edge_loss(net_output, target, flags, tile_n=256))
    assert jnp.allclose(out_small, ref, atol=1e-3, rtol=1e-3), (out_small, ref)

    # unpacked path on the same data (sublane packing disabled)
    out_np = jax.block_until_ready(
        dc_and_ce_ignore_edge_loss(net_output, target, flags,
                                   use_sublane_packing=False))
    assert jnp.allclose(out_np, ref, atol=1e-3, rtol=1e-3), (out_np, ref)

    # --- odd channel count / odd spatial size: generic unpacked path ---
    B2, C2, D2, H2, W2 = 1, 3, 5, 7, 9
    k2a, k2b = jax.random.split(jax.random.PRNGKey(1))
    x2 = jax.random.normal(k2a, (B2, C2, D2, H2, W2), dtype=jnp.float32)
    t2 = jax.random.randint(k2b, (B2, 1, D2, H2, W2), 0, C2, dtype=jnp.int32)
    f2 = jnp.array([1], dtype=jnp.int32)
    ref2 = _reference_loss(x2, t2, f2, k=3)
    out2 = jax.block_until_ready(dc_and_ce_ignore_edge_loss(x2, t2, f2))
    assert jnp.allclose(out2, ref2, atol=1e-3, rtol=1e-3), (out2, ref2)

    print("KERNEL_OK")
</pallas_src>

<mosaic_0001>
module attributes {stable_mosaic.version = 11 : i64} {
  func.func @_dc_ce_kernel(%arg0: i32, %arg1: i32, %arg2: memref<1x8x896xf32, #tpu.memory_space<vmem>>, %arg3: memref<1x2x896xi32, #tpu.memory_space<vmem>>, %arg4: memref<8x3xf32, #tpu.memory_space<vmem>>, %arg5: memref<1x1xf32, #tpu.memory_space<vmem>>, %arg6: memref<8x1xf32, #tpu.memory_space<vmem>>, %arg7: memref<8x1xf32, #tpu.memory_space<vmem>>, %arg8: memref<8x1xf32, #tpu.memory_space<vmem>>, %arg9: memref<1x1xf32, #tpu.memory_space<vmem>>) attributes {dimension_semantics = [#tpu.dimension_semantics<arbitrary>, #tpu.dimension_semantics<arbitrary>], iteration_bounds = array<i64: 2, 1>, scalar_prefetch = 0 : i64, scratch_operands = 4 : i64, tpu.core_type = #tpu.core_type<tc>, window_params = [{transform_indices = @transform_0, window_bounds = array<i64: 1, 8, 896>}, {transform_indices = @transform_1, window_bounds = array<i64: 1, 2, 896>}, {pipeline_mode = #tpu.pipeline_mode<synchronous>, transform_indices = @transform_2, window_bounds = array<i64: 8, 3>}, {pipeline_mode = #tpu.pipeline_mode<synchronous>, transform_indices = @transform_3, window_bounds = array<i64: 1, 1>}]} {
    %c0_i32 = arith.constant 0 : i32
    %0 = arith.cmpi eq, %arg0, %c0_i32 : i32
    %c0_i32_0 = arith.constant 0 : i32
    %1 = arith.cmpi eq, %arg1, %c0_i32_0 : i32
    %2 = arith.andi %0, %1 : i1
    %3 = arith.extui %2 : i1 to i32
    %c0_i32_1 = arith.constant 0 : i32
    %4 = arith.cmpi ne, %3, %c0_i32_1 : i32
    scf.if %4 {
      %cst = arith.constant 0.000000e+00 : f32
      %18 = vector.broadcast %cst : f32 to vector<8x1xf32>
      %c0 = arith.constant 0 : index
      %c0_7 = arith.constant 0 : index
      %19 = vector.load %arg6[%c0, %c0_7] : memref<8x1xf32, #tpu.memory_space<vmem>>, vector<8x1xf32>
      tpu.vector_store %arg6[%c0, %c0_7], %18 {strides = array<i32>} : memref<8x1xf32, #tpu.memory_space<vmem>>, vector<8x1xf32>,
      %cst_8 = arith.constant 0.000000e+00 : f32
      %20 = vector.broadcast %cst_8 : f32 to vector<8x1xf32>
      %c0_9 = arith.constant 0 : index
      %c0_10 = arith.constant 0 : index
      %21 = vector.load %arg7[%c0_9, %c0_10] : memref<8x1xf32, #tpu.memory_space<vmem>>, vector<8x1xf32>
      tpu.vector_store %arg7[%c0_9, %c0_10], %20 {strides = array<i32>} : memref<8x1xf32, #tpu.memory_space<vmem>>, vector<8x1xf32>,
      %cst_11 = arith.constant 0.000000e+00 : f32
      %22 = vector.broadcast %cst_11 : f32 to vector<8x1xf32>
      %c0_12 = arith.constant 0 : index
      %c0_13 = arith.constant 0 : index
      %23 = vector.load %arg8[%c0_12, %c0_13] : memref<8x1xf32, #tpu.memory_space<vmem>>, vector<8x1xf32>
      tpu.vector_store %arg8[%c0_12, %c0_13], %22 {strides = array<i32>} : memref<8x1xf32, #tpu.memory_space<vmem>>, vector<8x1xf32>,
      %cst_14 = arith.constant 0.000000e+00 : f32
      %24 = vector.broadcast %cst_14 : f32 to vector<1x1xf32>
      %c0_15 = arith.constant 0 : index
      %c0_16 = arith.constant 0 : index
      %25 = vector.load %arg9[%c0_15, %c0_16] : memref<1x1xf32, #tpu.memory_space<vmem>>, vector<1x1xf32>
      tpu.vector_store %arg9[%c0_15, %c0_16], %24 {strides = array<i32>} : memref<1x1xf32, #tpu.memory_space<vmem>>, vector<1x1xf32>,
    } else {
    }
    %c896_i32 = arith.constant 896 : i32
    %5 = arith.muli %arg1, %c896_i32 : i32
    %c896_i32_2 = arith.constant 896 : i32
    %6 = arith.addi %5, %c896_i32_2 : i32
    %c840_i32 = arith.constant 840 : i32
    %7 = arith.cmpi sgt, %6, %c840_i32 : i32
    %true = arith.constant true
    %8 = arith.xori %7, %true : i1
    %9 = arith.extui %8 : i1 to i32
    %c0_i32_3 = arith.constant 0 : i32
    %10 = arith.cmpi ne, %9, %c0_i32_3 : i32
    scf.if %10 {
      %c0 = arith.constant 0 : index
      %c0_7 = arith.constant 0 : index
      %c0_8 = arith.constant 0 : index
      %18 = vector.load %arg2[%c0, %c0_7, %c0_8] : memref<1x8x896xf32, #tpu.memory_space<vmem>>, vector<1x8x896xf32>
      %19 = vector.shape_cast %18 : vector<1x8x896xf32> to vector<8x896xf32>
      %c0_9 = arith.constant 0 : index
      %c0_10 = arith.constant 0 : index
      %c0_11 = arith.constant 0 : index
      %20 = vector.load %arg3[%c0_9, %c0_10, %c0_11] : memref<1x2x896xi32, #tpu.memory_space<vmem>>, vector<1x2x896xi32>
      %21 = vector.shape_cast %20 : vector<1x2x896xi32> to vector<2x896xi32>
      %22 = tpu.concatenate %21, %21, %21, %21 in 0 : vector<2x896xi32>, vector<2x896xi32>, vector<2x896xi32>, vector<2x896xi32> -> vector<8x896xi32>
      %c65535_i32 = arith.constant 65535 : i32
      %23 = vector.broadcast %c65535_i32 : i32 to vector<8x896xi32>
      %24 = arith.andi %22, %23 : vector<8x896xi32>
      %c16_i32 = arith.constant 16 : i32
      %25 = vector.broadcast %c16_i32 : i32 to vector<8x896xi32>
      %26 = arith.shrsi %22, %25 : vector<8x896xi32>
      %27 = arith.sitofp %26 : vector<8x896xi32> to vector<8x896xf32>
      %c4_i32 = arith.constant 4 : i32
      %28 = tpu.dynamic_rotate %19 by %c4_i32 dim 0 : vector<8x896xf32>, i32 -> vector<8x896xf32>
      %29 = arith.maximumf %19, %28 : vector<8x896xf32>
      %c2_i32 = arith.constant 2 : i32
      %30 = tpu.dynamic_rotate %29 by %c2_i32 dim 0 : vector<8x896xf32>, i32 -> vector<8x896xf32>
      %31 = arith.maximumf %29, %30 : vector<8x896xf32>
      %32 = arith.subf %19, %31 : vector<8x896xf32>
      %33 = math.exp %32 : vector<8x896xf32>
      %c4_i32_12 = arith.constant 4 : i32
      %34 = tpu.dynamic_rotate %33 by %c4_i32_12 dim 0 : vector<8x896xf32>, i32 -> vector<8x896xf32>
      %35 = arith.addf %33, %34 : vector<8x896xf32>
      %c2_i32_13 = arith.constant 2 : i32
      %36 = tpu.dynamic_rotate %35 by %c2_i32_13 dim 0 : vector<8x896xf32>, i32 -> vector<8x896xf32>
      %37 = arith.addf %35, %36 : vector<8x896xf32>
      %38 = tpu.reciprocal %37 {approx = true} : vector<8x896xf32> -> vector<8x896xf32>
      %39 = arith.mulf %37, %38 : vector<8x896xf32>
      %cst = arith.constant 2.000000e+00 : f32
      %40 = vector.broadcast %cst : f32 to vector<8x896xf32>
      %41 = arith.subf %40, %39 : vector<8x896xf32>
      %42 = arith.mulf %38, %41 : vector<8x896xf32>
      %43 = arith.mulf %33, %42 : vector<8x896xf32>
      %44 = tpu.iota {dimensions = array<i32: 0>} : vector<8x896xi32>
      %c1_i32_14 = arith.constant 1 : i32
      %45 = vector.broadcast %c1_i32_14 : i32 to vector<8x896xi32>
      %46 = arith.shrsi %44, %45 : vector<8x896xi32>
      %47 = arith.cmpi eq, %24, %46 : vector<8x896xi32>
      %48 = arith.mulf %43, %27 : vector<8x896xf32>
      %c0_15 = arith.constant 0 : index
      %c0_16 = arith.constant 0 : index
      %49 = vector.load %arg6[%c0_15, %c0_16] : memref<8x1xf32, #tpu.memory_space<vmem>>, vector<8x1xf32>
      %cst_17 = arith.constant 0.000000e+00 : f32
      %50 = vector.broadcast %cst_17 : f32 to vector<8x896xf32>
      %51 = arith.select %47, %48, %50 : vector<8x896xi1>, vector<8x896xf32>
      %cst_18 = arith.constant dense<0.000000e+00> : vector<8xf32>
      %52 = vector.multi_reduction <add>, %51, %cst_18 [1] : vector<8x896xf32> to vector<8xf32>
      %53 = vector.shape_cast %52 : vector<8xf32> to vector<8x1xf32>
      %54 = arith.addf %49, %53 : vector<8x1xf32>
      %c0_19 = arith.constant 0 : index
      %c0_20 = arith.constant 0 : index
      %55 = vector.load %arg6[%c0_19, %c0_20] : memref<8x1xf32, #tpu.memory_space<vmem>>, vector<8x1xf32>
      tpu.vector_store %arg6[%c0_19, %c0_20], %54 {strides = array<i32>} : memref<8x1xf32, #tpu.memory_space<vmem>>, vector<8x1xf32>,
      %c0_21 = arith.constant 0 : index
      %c0_22 = arith.constant 0 : index
      %56 = vector.load %arg7[%c0_21, %c0_22] : memref<8x1xf32, #tpu.memory_space<vmem>>, vector<8x1xf32>
      %cst_23 = arith.constant dense<0.000000e+00> : vector<8xf32>
      %57 = vector.multi_reduction <add>, %48, %cst_23 [1] : vector<8x896xf32> to vector<8xf32>
      %58 = vector.shape_cast %57 : vector<8xf32> to vector<8x1xf32>
      %59 = arith.addf %56, %58 : vector<8x1xf32>
      %c0_24 = arith.constant 0 : index
      %c0_25 = arith.constant 0 : index
      %60 = vector.load %arg7[%c0_24, %c0_25] : memref<8x1xf32, #tpu.memory_space<vmem>>, vector<8x1xf32>
      tpu.vector_store %arg7[%c0_24, %c0_25], %59 {strides = array<i32>} : memref<8x1xf32, #tpu.memory_space<vmem>>, vector<8x1xf32>,
      %c0_26 = arith.constant 0 : index
      %c0_27 = arith.constant 0 : index
      %61 = vector.load %arg8[%c0_26, %c0_27] : memref<8x1xf32, #tpu.memory_space<vmem>>, vector<8x1xf32>
      %cst_28 = arith.constant 0.000000e+00 : f32
      %62 = vector.broadcast %cst_28 : f32 to vector<8x896xf32>
      %63 = arith.select %47, %27, %62 : vector<8x896xi1>, vector<8x896xf32>
      %cst_29 = arith.constant dense<0.000000e+00> : vector<8xf32>
      %64 = vector.multi_reduction <add>, %63, %cst_29 [1] : vector<8x896xf32> to vector<8xf32>
      %65 = vector.shape_cast %64 : vector<8xf32> to vector<8x1xf32>
      %66 = arith.addf %61, %65 : vector<8x1xf32>
      %c0_30 = arith.constant 0 : index
      %c0_31 = arith.constant 0 : index
      %67 = vector.load %arg8[%c0_30, %c0_31] : memref<8x1xf32, #tpu.memory_space<vmem>>, vector<8x1xf32>
      tpu.vector_store %arg8[%c0_30, %c0_31], %66 {strides = array<i32>} : memref<8x1xf32, #tpu.memory_space<vmem>>, vector<8x1xf32>,
      %cst_32 = arith.constant 0.000000e+00 : f32
      %68 = vector.broadcast %cst_32 : f32 to vector<8x896xf32>
      %69 = arith.select %47, %32, %68 : vector<8x896xi1>, vector<8x896xf32>
      %c4_i32_33 = arith.constant 4 : i32
      %70 = tpu.dynamic_rotate %69 by %c4_i32_33 dim 0 : vector<8x896xf32>, i32 -> vector<8x896xf32>
      %71 = arith.addf %69, %70 : vector<8x896xf32>
      %c2_i32_34 = arith.constant 2 : i32
      %72 = tpu.dynamic_rotate %71 by %c2_i32_34 dim 0 : vector<8x896xf32>, i32 -> vector<8x896xf32>
      %73 = arith.addf %71, %72 : vector<8x896xf32>
      %74 = vector.extract_strided_slice %73 {offsets = [0, 0], sizes = [2, 896], strides = [1, 1]} : vector<8x896xf32> to vector<2x896xf32>
      %75 = vector.extract_strided_slice %37 {offsets = [0, 0], sizes = [2, 896], strides = [1, 1]} : vector<8x896xf32> to vector<2x896xf32>
      %76 = math.log %75 : vector<2x896xf32>
      %77 = arith.subf %76, %74 : vector<2x896xf32>
      %cst_35 = arith.constant dense<0.000000e+00> : vector<2xf32>
      %78 = vector.multi_reduction <add>, %77, %cst_35 [1] : vector<2x896xf32> to vector<2xf32>
      %79 = vector.shape_cast %78 : vector<2xf32> to vector<2x1xf32>
      %c0_36 = arith.constant 0 : index
      %c0_37 = arith.constant 0 : index
      %80 = vector.load %arg9[%c0_36, %c0_37] : memref<1x1xf32, #tpu.memory_space<vmem>>, vector<1x1xf32>
      %cst_38 = arith.constant dense<0.000000e+00> : vector<1xf32>
      %81 = vector.multi_reduction <add>, %79, %cst_38 [0] : vector<2x1xf32> to vector<1xf32>
      %82 = vector.shape_cast %81 : vector<1xf32> to vector<1x1xf32>
      %83 = arith.addf %80, %82 : vector<1x1xf32>
      %c0_39 = arith.constant 0 : index
      %c0_40 = arith.constant 0 : index
      %84 = vector.load %arg9[%c0_39, %c0_40] : memref<1x1xf32, #tpu.memory_space<vmem>>, vector<1x1xf32>
      tpu.vector_store %arg9[%c0_39, %c0_40], %83 {strides = array<i32>} : memref<1x1xf32, #tpu.memory_space<vmem>>, vector<1x1xf32>,
    } else {
    }
    %11 = arith.extui %7 : i1 to i32
    %c0_i32_4 = arith.constant 0 : i32
    %12 = arith.cmpi ne, %11, %c0_i32_4 : i32
    scf.if %12 {
      %c0 = arith.constant 0 : index
      %c0_7 = arith.constant 0 : index
      %c0_8 = arith.constant 0 : index
      %18 = vector.load %arg2[%c0, %c0_7, %c0_8] : memref<1x8x896xf32, #tpu.memory_space<vmem>>, vector<1x8x896xf32>
      %19 = vector.shape_cast %18 : vector<1x8x896xf32> to vector<8x896xf32>
      %c0_9 = arith.constant 0 : index
      %c0_10 = arith.constant 0 : index
      %c0_11 = arith.constant 0 : index
      %20 = vector.load %arg3[%c0_9, %c0_10, %c0_11] : memref<1x2x896xi32, #tpu.memory_space<vmem>>, vector<1x2x896xi32>
      %21 = vector.shape_cast %20 : vector<1x2x896xi32> to vector<2x896xi32>
      %22 = tpu.concatenate %21, %21, %21, %21 in 0 : vector<2x896xi32>, vector<2x896xi32>, vector<2x896xi32>, vector<2x896xi32> -> vector<8x896xi32>
      %c65535_i32 = arith.constant 65535 : i32
      %23 = vector.broadcast %c65535_i32 : i32 to vector<8x896xi32>
      %24 = arith.andi %22, %23 : vector<8x896xi32>
      %c16_i32 = arith.constant 16 : i32
      %25 = vector.broadcast %c16_i32 : i32 to vector<8x896xi32>
      %26 = arith.shrsi %22, %25 : vector<8x896xi32>
      %27 = arith.sitofp %26 : vector<8x896xi32> to vector<8x896xf32>
      %28 = tpu.iota {dimensions = array<i32: 1>} : vector<1x896xi32>
      %29 = vector.broadcast %5 : i32 to vector<1x896xi32>
      %30 = arith.addi %29, %28 : vector<1x896xi32>
      %c840_i32_12 = arith.constant 840 : i32
      %31 = vector.broadcast %c840_i32_12 : i32 to vector<1x896xi32>
      %32 = arith.cmpi slt, %30, %31 : vector<1x896xi32>
      %cst = arith.constant 0.000000e+00 : f32
      %33 = vector.shape_cast %32 : vector<1x896xi1> to vector<1x896xi1>
      %34 = vector.broadcast %33 : vector<1x896xi1> to vector<8x896xi1>
      %35 = vector.broadcast %cst : f32 to vector<8x896xf32>
      %36 = arith.select %34, %19, %35 : vector<8x896xi1>, vector<8x896xf32>
      %cst_13 = arith.constant 0.000000e+00 : f32
      %37 = vector.shape_cast %32 : vector<1x896xi1> to vector<1x896xi1>
      %38 = vector.broadcast %37 : vector<1x896xi1> to vector<8x896xi1>
      %39 = vector.broadcast %cst_13 : f32 to vector<8x896xf32>
      %40 = arith.select %38, %27, %39 : vector<8x896xi1>, vector<8x896xf32>
      %c4_i32 = arith.constant 4 : i32
      %41 = tpu.dynamic_rotate %36 by %c4_i32 dim 0 : vector<8x896xf32>, i32 -> vector<8x896xf32>
      %42 = arith.maximumf %36, %41 : vector<8x896xf32>
      %c2_i32 = arith.constant 2 : i32
      %43 = tpu.dynamic_rotate %42 by %c2_i32 dim 0 : vector<8x896xf32>, i32 -> vector<8x896xf32>
      %44 = arith.maximumf %42, %43 : vector<8x896xf32>
      %45 = arith.subf %36, %44 : vector<8x896xf32>
      %46 = math.exp %45 : vector<8x896xf32>
      %c4_i32_14 = arith.constant 4 : i32
      %47 = tpu.dynamic_rotate %46 by %c4_i32_14 dim 0 : vector<8x896xf32>, i32 -> vector<8x896xf32>
      %48 = arith.addf %46, %47 : vector<8x896xf32>
      %c2_i32_15 = arith.constant 2 : i32
      %49 = tpu.dynamic_rotate %48 by %c2_i32_15 dim 0 : vector<8x896xf32>, i32 -> vector<8x896xf32>
      %50 = arith.addf %48, %49 : vector<8x896xf32>
      %51 = tpu.reciprocal %50 {approx = true} : vector<8x896xf32> -> vector<8x896xf32>
      %52 = arith.mulf %50, %51 : vector<8x896xf32>
      %cst_16 = arith.constant 2.000000e+00 : f32
      %53 = vector.broadcast %cst_16 : f32 to vector<8x896xf32>
      %54 = arith.subf %53, %52 : vector<8x896xf32>
      %55 = arith.mulf %51, %54 : vector<8x896xf32>
      %56 = arith.mulf %46, %55 : vector<8x896xf32>
      %57 = tpu.iota {dimensions = array<i32: 0>} : vector<8x896xi32>
      %c1_i32_17 = arith.constant 1 : i32
      %58 = vector.broadcast %c1_i32_17 : i32 to vector<8x896xi32>
      %59 = arith.shrsi %57, %58 : vector<8x896xi32>
      %60 = arith.cmpi eq, %24, %59 : vector<8x896xi32>
      %61 = arith.mulf %56, %40 : vector<8x896xf32>
      %c0_18 = arith.constant 0 : index
      %c0_19 = arith.constant 0 : index
      %62 = vector.load %arg6[%c0_18, %c0_19] : memref<8x1xf32, #tpu.memory_space<vmem>>, vector<8x1xf32>
      %cst_20 = arith.constant 0.000000e+00 : f32
      %63 = vector.broadcast %cst_20 : f32 to vector<8x896xf32>
      %64 = arith.select %60, %61, %63 : vector<8x896xi1>, vector<8x896xf32>
      %cst_21 = arith.constant dense<0.000000e+00> : vector<8xf32>
      %65 = vector.multi_reduction <add>, %64, %cst_21 [1] : vector<8x896xf32> to vector<8xf32>
      %66 = vector.shape_cast %65 : vector<8xf32> to vector<8x1xf32>
      %67 = arith.addf %62, %66 : vector<8x1xf32>
      %c0_22 = arith.constant 0 : index
      %c0_23 = arith.constant 0 : index
      %68 = vector.load %arg6[%c0_22, %c0_23] : memref<8x1xf32, #tpu.memory_space<vmem>>, vector<8x1xf32>
      tpu.vector_store %arg6[%c0_22, %c0_23], %67 {strides = array<i32>} : memref<8x1xf32, #tpu.memory_space<vmem>>, vector<8x1xf32>,
      %c0_24 = arith.constant 0 : index
      %c0_25 = arith.constant 0 : index
      %69 = vector.load %arg7[%c0_24, %c0_25] : memref<8x1xf32, #tpu.memory_space<vmem>>, vector<8x1xf32>
      %cst_26 = arith.constant dense<0.000000e+00> : vector<8xf32>
      %70 = vector.multi_reduction <add>, %61, %cst_26 [1] : vector<8x896xf32> to vector<8xf32>
      %71 = vector.shape_cast %70 : vector<8xf32> to vector<8x1xf32>
      %72 = arith.addf %69, %71 : vector<8x1xf32>
      %c0_27 = arith.constant 0 : index
      %c0_28 = arith.constant 0 : index
      %73 = vector.load %arg7[%c0_27, %c0_28] : memref<8x1xf32, #tpu.memory_space<vmem>>, vector<8x1xf32>
      tpu.vector_store %arg7[%c0_27, %c0_28], %72 {strides = array<i32>} : memref<8x1xf32, #tpu.memory_space<vmem>>, vector<8x1xf32>,
      %c0_29 = arith.constant 0 : index
      %c0_30 = arith.constant 0 : index
      %74 = vector.load %arg8[%c0_29, %c0_30] : memref<8x1xf32, #tpu.memory_space<vmem>>, vector<8x1xf32>
      %cst_31 = arith.constant 0.000000e+00 : f32
      %75 = vector.broadcast %cst_31 : f32 to vector<8x896xf32>
      %76 = arith.select %60, %40, %75 : vector<8x896xi1>, vector<8x896xf32>
      %cst_32 = arith.constant dense<0.000000e+00> : vector<8xf32>
      %77 = vector.multi_reduction <add>, %76, %cst_32 [1] : vector<8x896xf32> to vector<8xf32>
      %78 = vector.shape_cast %77 : vector<8xf32> to vector<8x1xf32>
      %79 = arith.addf %74, %78 : vector<8x1xf32>
      %c0_33 = arith.constant 0 : index
      %c0_34 = arith.constant 0 : index
      %80 = vector.load %arg8[%c0_33, %c0_34] : memref<8x1xf32, #tpu.memory_space<vmem>>, vector<8x1xf32>
      tpu.vector_store %arg8[%c0_33, %c0_34], %79 {strides = array<i32>} : memref<8x1xf32, #tpu.memory_space<vmem>>, vector<8x1xf32>,
      %cst_35 = arith.constant 0.000000e+00 : f32
      %81 = vector.broadcast %cst_35 : f32 to vector<8x896xf32>
      %82 = arith.select %60, %45, %81 : vector<8x896xi1>, vector<8x896xf32>
      %c4_i32_36 = arith.constant 4 : i32
      %83 = tpu.dynamic_rotate %82 by %c4_i32_36 dim 0 : vector<8x896xf32>, i32 -> vector<8x896xf32>
      %84 = arith.addf %82, %83 : vector<8x896xf32>
      %c2_i32_37 = arith.constant 2 : i32
      %85 = tpu.dynamic_rotate %84 by %c2_i32_37 dim 0 : vector<8x896xf32>, i32 -> vector<8x896xf32>
      %86 = arith.addf %84, %85 : vector<8x896xf32>
      %87 = vector.extract_strided_slice %86 {offsets = [0, 0], sizes = [2, 896], strides = [1, 1]} : vector<8x896xf32> to vector<2x896xf32>
      %88 = vector.extract_strided_slice %50 {offsets = [0, 0], sizes = [2, 896], strides = [1, 1]} : vector<8x896xf32> to vector<2x896xf32>
      %89 = math.log %88 : vector<2x896xf32>
      %90 = arith.subf %89, %87 : vector<2x896xf32>
      %cst_38 = arith.constant 0.000000e+00 : f32
      %91 = vector.shape_cast %32 : vector<1x896xi1> to vector<1x896xi1>
      %92 = vector.broadcast %91 : vector<1x896xi1> to vector<2x896xi1>
      %93 = vector.broadcast %cst_38 : f32 to vector<2x896xf32>
      %94 = arith.select %92, %90, %93 : vector<2x896xi1>, vector<2x896xf32>
      %cst_39 = arith.constant dense<0.000000e+00> : vector<2xf32>
      %95 = vector.multi_reduction <add>, %94, %cst_39 [1] : vector<2x896xf32> to vector<2xf32>
      %96 = vector.shape_cast %95 : vector<2xf32> to vector<2x1xf32>
      %c0_40 = arith.constant 0 : index
      %c0_41 = arith.constant 0 : index
      %97 = vector.load %arg9[%c0_40, %c0_41] : memref<1x1xf32, #tpu.memory_space<vmem>>, vector<1x1xf32>
      %cst_42 = arith.constant dense<0.000000e+00> : vector<1xf32>
      %98 = vector.multi_reduction <add>, %96, %cst_42 [0] : vector<2x1xf32> to vector<1xf32>
      %99 = vector.shape_cast %98 : vector<1xf32> to vector<1x1xf32>
      %100 = arith.addf %97, %99 : vector<1x1xf32>
      %c0_43 = arith.constant 0 : index
      %c0_44 = arith.constant 0 : index
      %101 = vector.load %arg9[%c0_43, %c0_44] : memref<1x1xf32, #tpu.memory_space<vmem>>, vector<1x1xf32>
      tpu.vector_store %arg9[%c0_43, %c0_44], %100 {strides = array<i32>} : memref<1x1xf32, #tpu.memory_space<vmem>>, vector<1x1xf32>,
    } else {
    }
    %c1_i32 = arith.constant 1 : i32
    %13 = arith.cmpi eq, %arg0, %c1_i32 : i32
    %c0_i32_5 = arith.constant 0 : i32
    %14 = arith.cmpi eq, %arg1, %c0_i32_5 : i32
    %15 = arith.andi %13, %14 : i1
    %16 = arith.extui %15 : i1 to i32
    %c0_i32_6 = arith.constant 0 : i32
    %17 = arith.cmpi ne, %16, %c0_i32_6 : i32
    scf.if %17 {
      %c0 = arith.constant 0 : index
      %c0_7 = arith.constant 0 : index
      %18 = vector.load %arg6[%c0, %c0_7] : memref<8x1xf32, #tpu.memory_space<vmem>>, vector<8x1xf32>
      %c0_8 = arith.constant 0 : index
      %c0_9 = arith.constant 0 : index
      %19 = vector.load %arg4[%c0_8, %c0_9] : memref<8x3xf32, #tpu.memory_space<vmem>>, vector<8x1xf32>
      tpu.vector_store %arg4[%c0_8, %c0_9], %18 {strides = array<i32>} : memref<8x3xf32, #tpu.memory_space<vmem>>, vector<8x1xf32>,
      %c0_10 = arith.constant 0 : index
      %c0_11 = arith.constant 0 : index
      %20 = vector.load %arg7[%c0_10, %c0_11] : memref<8x1xf32, #tpu.memory_space<vmem>>, vector<8x1xf32>
      %c0_12 = arith.constant 0 : index
      %c1 = arith.constant 1 : index
      %21 = vector.load %arg4[%c0_12, %c1] : memref<8x3xf32, #tpu.memory_space<vmem>>, vector<8x1xf32>
      tpu.vector_store %arg4[%c0_12, %c1], %20 {strides = array<i32>} : memref<8x3xf32, #tpu.memory_space<vmem>>, vector<8x1xf32>,
      %c0_13 = arith.constant 0 : index
      %c0_14 = arith.constant 0 : index
      %22 = vector.load %arg8[%c0_13, %c0_14] : memref<8x1xf32, #tpu.memory_space<vmem>>, vector<8x1xf32>
      %c0_15 = arith.constant 0 : index
      %c2 = arith.constant 2 : index
      %23 = vector.load %arg4[%c0_15, %c2] : memref<8x3xf32, #tpu.memory_space<vmem>>, vector<8x1xf32>
      tpu.vector_store %arg4[%c0_15, %c2], %22 {strides = array<i32>} : memref<8x3xf32, #tpu.memory_space<vmem>>, vector<8x1xf32>,
      %c0_16 = arith.constant 0 : index
      %c0_17 = arith.constant 0 : index
      %24 = vector.load %arg9[%c0_16, %c0_17] : memref<1x1xf32, #tpu.memory_space<vmem>>, vector<1x1xf32>
      %c0_18 = arith.constant 0 : index
      %c0_19 = arith.constant 0 : index
      %25 = vector.load %arg5[%c0_18, %c0_19] : memref<1x1xf32, #tpu.memory_space<vmem>>, vector<1x1xf32>
      tpu.vector_store %arg5[%c0_18, %c0_19], %24 {strides = array<i32>} : memref<1x1xf32, #tpu.memory_space<vmem>>, vector<1x1xf32>,
    } else {
    }
    return
  }
  func.func @transform_0(%arg0: i32, %arg1: i32) -> (i32, i32, i32) {
    %c0_i32 = arith.constant 0 : i32
    %c0_i32_0 = arith.constant 0 : i32
    return %arg0, %c0_i32, %arg1 : i32, i32, i32
  }
  func.func @transform_1(%arg0: i32, %arg1: i32) -> (i32, i32, i32) {
    %c0_i32 = arith.constant 0 : i32
    %c0_i32_0 = arith.constant 0 : i32
    return %arg0, %c0_i32, %arg1 : i32, i32, i32
  }
  func.func @transform_2(%arg0: i32, %arg1: i32) -> (i32, i32) {
    %c0_i32 = arith.constant 0 : i32
    %c0_i32_0 = arith.constant 0 : i32
    %c0_i32_1 = arith.constant 0 : i32
    return %c0_i32, %c0_i32_0 : i32, i32
  }
  func.func @transform_3(%arg0: i32, %arg1: i32) -> (i32, i32) {
    %c0_i32 = arith.constant 0 : i32
    %c0_i32_0 = arith.constant 0 : i32
    %c0_i32_1 = arith.constant 0 : i32
    return %c0_i32, %c0_i32_0 : i32, i32
  }
}

</mosaic_0001>

<bundles_post_ra>
// kernel: squeeze.4
= control target key start
LH: loop header
LB: loop body
LE: loop exit
PB: predicated region body
PF: predicated region fallthrough
CT: control target
= control target key end

     0   :  { %s37_s8 = smov 122   ;;  %vm7_vm0 = vcmask 15360   ;;  %s38_s9 = smov 124   ;;  %s55_s0 = inlined_call_operand.vmem [shape: f32[8], index: 0, kind: input, shape index: {}]   ;;  %s56_s1 = inlined_call_operand.vmem [shape: f32[4,2], index: 1, kind: output, shape index: {}]  }
   0x1   :  { %v4_v0 = vld [vmem:[%s55_s0] sm:$0x1]  ;;  %s36_s0 = smov 126  }
   0x2   :  { %5 = vst [vmem:[#allocation1] sm:$0x1] %v4_v0 }
   0x9   :  { %v9_v1 = vld [vmem:[#allocation1] sm:$0x1]  }
   0xa   :  { %v21_v2 = vld [vmem:[#allocation1] sm:$0x1]   ;;  %10 = vrot.lane.b32.xlu0 %v9_v1, %s36_s0 }
   0xb   :  { %22 = vrot.lane.b32.xlu1 %v21_v2, %s37_s8  ;;  %v6_v3 = vld [vmem:[#allocation1] sm:$0x1]  }
   0xc   :  { %v15_v4 = vld [vmem:[#allocation1] sm:$0x1]   ;;  %8 = vst.msk [vmem:[#allocation0] sm:$0x1] %vm7_vm0, %v6_v3  }
   0xe   :  { %16 = vrot.lane.b32.xlu0 %v15_v4, %s38_s9 }
  0x7c   :  { %v11_v5 = vpop.permute.xlu0 %10  }
  0x7d   :  { %v23_v6 = vpop.permute.xlu1 %22   ;;  %14 = vst.msk [vmem:[#allocation0 + $0x1] sm:$0x1] %vm7_vm0, %v11_v5  }
  0x7e   :  { %26 = vst.msk [vmem:[#allocation0 + $0x3] sm:$0x1] %vm7_vm0, %v23_v6  }
  0x80   :  { %v17_v7 = vpop.permute.xlu0 %16  }
  0x81   :  { %20 = vst.msk [vmem:[#allocation0 + $0x2] sm:$0x1] %vm7_vm0, %v17_v7  }
  0x88   :  { %v30_v8 = vld [vmem:[#allocation0] sm:$0xf] }
  0x89   :  { %32 = vst [vmem:[%s56_s1] sm:$0xf] %v30_v8 }

// kernel: dc_and_ce_ignore_edge_loss.1
= control target key start
LH: loop header
LB: loop body
LE: loop exit
PB: predicated region body
PF: predicated region fallthrough
CT: control target
= control target key end

     0   :  { %9 = vsyncpa [#allocation7], 0  ;;  %s1325_s12 = smov 0   ;;  %s1327_s13 = smov 0   ;;  %s1700_s0 = inlined_call_operand.vmem [shape: f32[2,8,840], index: 0, kind: input, shape index: {}]   ;;  %s1701_s1 = inlined_call_operand.vmem [shape: s32[2,2,840], index: 1, kind: input, shape index: {}]   ;;  %s1702_s2 = inlined_call_operand.vmem [shape: f32[8,3], index: 2, kind: output, shape index: {0}]   ;;  %s1703_s3 = inlined_call_operand.hbm [shape: f32[1,1], index: 3, kind: output, shape index: {1}]  }
   0x1   :  { %s1329_s14 = smov 0  }
   0x2 LB: > { %s1149_s15 = sadd.s32 4294967295, %s1298_s14   ;;  %s27_s16 = sadd.s32 1, %s1294_s13  ;;  %s1298_s14 = sphi %s1329_s14, %s15_s14   ;;  %s1294_s13 = sphi %s1327_s13, %s1726_s13   ;;  %s1290_s12 = sphi %s1325_s12, %s1725_s12  }
   0x3   : > { %p29_p0 = scmp.ge.s32.totalorder %s27_s16, 2  ;;  %p1152_p1 = scmp.ge.s32.totalorder %s1298_s14, 1 }
   0x4   : > { %p167_p2 = scmp.lt.s32.totalorder %s1298_s14, 3 }
   0x5   : > { %s1728_s16 = smov (%p29_p0, %s27_s16), 0 }
   0x6   : > { %p168_p3 = pnand %p1152_p1, %p167_p2 }
   0x8   : > { %171 = sbr.rel (%p168_p3) target bundleno = 408 (0x198), region = 28 }
   0xf   : > { %p200_p4 = scmp.lt.s32.totalorder %s1290_s12, 1  ;;  %p219_p5 = scmp.eq.s32.totalorder %s1290_s12, 0 }
  0x10   : > { %vm225_vm0 = vcmask (%p219_p5), 7168   ;;  %vm229_vm1 = vcmask (%p219_p5), 0   ;;  %v1300_v0 = vmov (%p219_p5), 0.0  }
  0x11   : > { %s201_s17 = scalar_select %p200_p4, %s1290_s12, 1 }
  0x12   : > { %224 = sbr.rel (!%p219_p5) target bundleno = 25 (0x19), region = 32  ;;  %226 = vst.msk [vmem:[#allocation2] sm:$0xff] (%p219_p5), %vm225_vm0, %v1300_v0  ;;  %227 = vst.msk [vmem:[#allocation3] sm:$0xff] (%p219_p5), %vm225_vm0, %v1300_v0 }
  0x13   : > { %s1163_s18 = smul.u32 56, %s201_s17  ;;  %228 = vst.msk [vmem:[#allocation4] sm:$0xff] (%p219_p5), %vm225_vm0, %v1300_v0 }
  0x14   : > { %s1164_s19 = smul.u32 14, %s201_s17  ;;  %230 = vst.msk [vmem:[#allocation5] sm:$0x1] (%p219_p5), %vm229_vm1, %v1300_v0 }
  0x15   : > { %s1352_s22 = scalar_lea.vmem %s1700_s0, %s1163_s18 }
  0x16   : > { %s217_s25 = scalar_lea.vmem %s1701_s1, %s1164_s19 }
  0x19 PF: > { %v624_v1 = vlaneseq  ;;  %v1301_v2 = vmov 1983009808   ;;  %v618_v4 = vld [vmem:[%s217_s25] sm:$0xff]  ;;  %v619_v5 = vld [vmem:[%s217_s25 + $0x8] sm:$0x3f]  ;;  %v1367_v15 = vld [vmem:[%s1352_s22 + $0x10] sm:$0xff] }
  0x1a   : > { %v622_v3 = vunpack.c.l.s4 %v1301_v2  ;;  %v653_v9 = vcombine.low %v618_v4, %v618_v4  ;;  %v620_v10 = vcombine.high %v618_v4, %v618_v4  ;;  %v662_v12 = vcombine.low %v619_v5, %v619_v5  ;;  %v1361_v13 = vld [vmem:[%s1352_s22] sm:$0xff]  ;;  %v1364_v14 = vld [vmem:[%s1352_s22 + $0x8] sm:$0xff]  ;;  %v1374_v18 = vld [vmem:[%s1352_s22 + $0x18] sm:$0xff]  ;;  %p1039_p6 = scmp.eq.s32.totalorder %s1290_s12, 1 }
  0x1b   : > { %v1357_v6 = vshrl.u32 %v624_v1, 7  ;;  %v723_v8 = vand.u32 127, %v624_v1  ;;  %v637_v19 = vcombine.high %v619_v5, %v619_v5  ;;  %v1379_v21 = vld [vmem:[%s1352_s22 + $0x20] sm:$0xff]  ;;  %v1382_v22 = vld [vmem:[%s1352_s22 + $0x28] sm:$0xff]  ;;  %v773_v26 = vrot.slane %v1361_v13, 4  ;;  %v617_v29 = vld [vmem:[%s1352_s22 + $0x30] sm:$0xff] }
  0x1c   : > { %v623_v7 = vunpack.c.0.s8 %v622_v3  ;;  %vm677_vm2 = vcmask 1041408   ;;  %v774_v27 = vrot.slane %v1364_v14, 4  ;;  %v775_v28 = vrot.slane %v1367_v15, 4  ;;  %s1302_s26 = smov (%p1039_p6), 1   ;;  %s1303_s29 = smov (%p1039_p6), 2  }
  0x1d   : > { %v1371_v17 = vadd.s32 768, %v723_v8  ;;  %v776_v32 = vrot.slane %v1374_v18, 4  ;;  %vm685_vm4 = vcmask 1043456   ;;  %v777_v34 = vrot.slane %v1379_v21, 4 }
  0x1e   : > { %v626_v11 = vsub.s32 %v623_v7, %v1357_v6  ;;  %v778_v35 = vrot.slane %v1382_v22, 4  ;;  %v780_v39 = vmax.f32 %v1361_v13, %v773_v26  ;;  %v781_v42 = vmax.f32 %v1364_v14, %v774_v27 }
  0x1f   : > { %vm744_vm3 = vcmp.lt.s32.totalorder %v1371_v17, 840  ;;  %v782_v43 = vmax.f32 %v1367_v15, %v775_v28  ;;  %v783_v47 = vmax.f32 %v1374_v18, %v776_v32  ;;  %vm693_vm5 = vcmask 1045504  }
  0x20   : > { %v1369_v16 = vrot.slane %v618_v4, %v626_v11  ;;  %v1376_v20 = vrot.slane %v653_v9, %v626_v11  ;;  %v634_v23 = vrot.slane %v620_v10, %v626_v11  ;;  %v1384_v24 = vrot.slane %v619_v5, %v626_v11 }
  0x21   : > { %v1386_v25 = vrot.slane %v662_v12, %v626_v11  ;;  %v1398_v33 = vrot.slane %v637_v19, %v626_v11  ;;  %v765_v41 = vsel %vm744_vm3, %v617_v29, 0.0  ;;  %v784_v60 = vmax.f32 %v1379_v21, %v777_v34 }
  0x22   : > { %v635_v30 = vcombine.high %v1369_v16, %v1369_v16  ;;  %v661_v31 = vcombine.high %v1376_v20, %v1376_v20  ;;  %v636_v36 = vcombine.high %v634_v23, %v634_v23  ;;  %v652_v37 = vcombine.high %v1384_v24, %v1384_v24 }
  0x23   : > { %v670_v38 = vcombine.high %v1386_v25, %v1386_v25  ;;  %v671_v40 = vcombine.low %v1369_v16, %v1369_v16  ;;  %v672_v44 = vcombine.low %v634_v23, %v634_v23  ;;  %v678_v45 = vsel %vm677_vm2, %v1369_v16, %v1376_v20 }
  0x24   : > { %v679_v46 = vsel %vm677_vm2, %v635_v30, %v661_v31  ;;  %v673_v48 = vcombine.low %v1384_v24, %v1384_v24  ;;  %v674_v49 = vcombine.low %v1398_v33, %v1398_v33  ;;  %v675_v50 = vcombine.low %v1376_v20, %v1376_v20 }
  0x25   : > { %v676_v51 = vcombine.low %v1386_v25, %v1386_v25  ;;  %v680_v52 = vsel %vm677_vm2, %v634_v23, %v1369_v16  ;;  %v681_v53 = vsel %vm677_vm2, %v636_v36, %v635_v30  ;;  %v682_v54 = vsel %vm677_vm2, %v1384_v24, %v1386_v25 }
  0x26   : > { %v683_v55 = vsel %vm677_vm2, %v652_v37, %v670_v38  ;;  %v684_v56 = vsel %vm677_vm2, %v1398_v33, %v1384_v24  ;;  %v686_v57 = vsel %vm685_vm4, %v678_v45, %v671_v40  ;;  %v687_v58 = vsel %vm685_vm4, %v679_v46, %v1369_v16 }
  0x27   : > { %v779_v59 = vrot.slane %v765_v41, 4  ;;  %v785_v61 = vmax.f32 %v1382_v22, %v778_v35  ;;  %v787_v62 = vrot.slane %v780_v39, 6  ;;  %v788_v63 = vrot.slane %v781_v42, 6 }
  0x28   : > { %v688_v0 = vsel %vm685_vm4, %v680_v52, %v672_v44  ;;  %v789_v2 = vrot.slane %v782_v43, 6  ;;  %v790_v3 = vrot.slane %v783_v47, 6  ;;  %v791_v4 = vrot.slane %v784_v60, 6 }
  0x29   : > { %v786_v1 = vmax.f32 %v765_v41, %v779_v59  ;;  %v792_v5 = vrot.slane %v785_v61, 6  ;;  %v794_v7 = vmax.f32 %v780_v39, %v787_v62  ;;  %v795_v8 = vmax.f32 %v781_v42, %v788_v63 }
  0x2a   : > { %v689_v9 = vsel %vm685_vm4, %v681_v53, %v634_v23  ;;  %v796_v11 = vmax.f32 %v782_v43, %v789_v2  ;;  %v797_v12 = vmax.f32 %v783_v47, %v790_v3  ;;  %v798_v19 = vmax.f32 %v784_v60, %v791_v4 }
  0x2b   : > { %v793_v10 = vrot.slane %v786_v1, 6  ;;  %v799_v26 = vmax.f32 %v785_v61, %v792_v5  ;;  %v801_v27 = vsub.f32 %v1361_v13, %v794_v7  ;;  %v802_v28 = vsub.f32 %v1364_v14, %v795_v8 }
  0x2c   : > { %v690_v29 = vsel %vm685_vm4, %v682_v54, %v673_v48  ;;  %v803_v31 = vsub.f32 %v1367_v15, %v796_v11  ;;  %v804_v32 = vsub.f32 %v1374_v18, %v797_v12  ;;  %v805_v33 = vsub.f32 %v1379_v21, %v798_v19 }
  0x2d   : > { %v800_v30 = vmax.f32 %v786_v1, %v793_v10  ;;  %v806_v23 = vsub.f32 %v1382_v22, %v799_v26  ;;  %v808_v34 = vmul.f32 1.442695, %v801_v27  ;;  %v810_v35 = vmul.f32 1.442695, %v802_v28 }
  0x2e   : > { %v691_v36 = vsel %vm685_vm4, %v683_v55, %v1384_v24  ;;  %v812_v13 = vmul.f32 1.442695, %v803_v31  ;;  %v814_v38 = vmul.f32 1.442695, %v804_v32  ;;  %v692_v14 = vsel %vm685_vm4, %v684_v56, %v674_v49 }
  0x2f   : > { %v807_v37 = vsub.f32 %v765_v41, %v800_v30  ;;  %v1454_v39 = vsel %vm693_vm5, %v686_v57, %v675_v50  ;;  %1204 = vpow2.f32 %v808_v34  ;;  %v816_v15 = vmul.f32 1.442695, %v805_v33 }
  0x30   : > { %v1458_v18 = vsel %vm693_vm5, %v687_v58, %v1376_v20  ;;  %v1461_v21 = vsel %vm693_vm5, %v688_v0, %v671_v40  ;;  %1206 = vpow2.f32 %v810_v35  ;;  %v818_v22 = vmul.f32 1.442695, %v806_v23 }
  0x31   : > { %v1465_v24 = vsel %vm693_vm5, %v689_v9, %v1369_v16  ;;  %v1468_v41 = vsel %vm693_vm5, %v690_v29, %v676_v51  ;;  %1208 = vpow2.f32 %v812_v13  ;;  %v820_v42 = vmul.f32 1.442695, %v807_v37 }
  0x32   : > { %v1472_v43 = vsel %vm693_vm5, %v691_v36, %v1386_v25  ;;  %v1475_v20 = vsel %vm693_vm5, %v692_v14, %v673_v48  ;;  %1210 = vpow2.f32 %v814_v38  ;;  %v701_v40 = vand.u32 65535, %v1454_v39 }
  0x33   : > { %v702_v44 = vand.u32 65535, %v1458_v18  ;;  %1212 = vpow2.f32 %v816_v15  ;;  %v887_v16 = vshra.s32 %v1357_v6, 1  ;;  %v703_v45 = vand.u32 65535, %v1461_v21 }
  0x34   : > { %v704_v46 = vand.u32 65535, %v1465_v24  ;;  %v705_v47 = vand.u32 65535, %v1468_v41  ;;  %1214 = vpow2.f32 %v818_v22  ;;  %v706_v25 = vand.u32 65535, %v1472_v43 }
  0x35   : > { %v707_v48 = vand.u32 65535, %v1475_v20  ;;  %1216 = vpow2.f32 %v820_v42  ;;  %vm1485_vm6 = vcmp.eq.s32.totalorder %v701_v40, %v887_v16  ;;  %vm1489_vm7 = vcmp.eq.s32.totalorder %v702_v44, %v887_v16 }
  0x36   : > { %vm1493_vm8 = vcmp.eq.s32.totalorder %v703_v45, %v887_v16  ;;  %vm1497_vm9 = vcmp.eq.s32.totalorder %v704_v46, %v887_v16  ;;  %vm1501_vm10 = vcmp.eq.s32.totalorder %v705_v47, %v887_v16  ;;  %vm1507_vm11 = vcmp.eq.s32.totalorder %v706_v25, %v887_v16 }
  0x37   : > { %vm1511_vm12 = vcmp.eq.s32.totalorder %v707_v48, %v887_v16  ;;  %v1718_v55 = vmov 0  ;;  %v950_v58 = vsel %vm1485_vm6, %v801_v27, 0.0  ;;  %v951_v59 = vsel %vm1489_vm7, %v802_v28, 0.0 }
  0x38   : > { %v1719_v55 = vsel %vm1511_vm12, 4294967295, %v1718_v55  ;;  %v952_v62 = vsel %vm1493_vm8, %v803_v31, 0.0  ;;  %v953_v63 = vsel %vm1497_vm9, %v804_v32, 0.0  ;;  %v954_v0 = vsel %vm1501_vm10, %v805_v33, 0.0 }
  0x39   : > { %v1505_v53 = vpop.eup %1204  ;;  %1720 = vst [vmem:[#allocation9_spill] sm:$0xff] %v1719_v55  ;;  %v955_v4 = vsel %vm1507_vm11, %v806_v23, 0.0  ;;  %v956_v5 = vsel %vm1511_vm12, %v807_v37, 0.0  ;;  %v957_v10 = vrot.slane %v950_v58, 4  ;;  %v958_v11 = vrot.slane %v951_v59, 4 }
  0x3a   : > { %v1515_v56 = vpop.eup %1206  ;;  %v822_v57 = vrot.slane %v1505_v53, 4  ;;  %v959_v28 = vrot.slane %v952_v62, 4  ;;  %v960_v33 = vrot.slane %v953_v63, 4  ;;  %v961_v14 = vrot.slane %v954_v0, 4 }
  0x3b   : > { %v1522_v60 = vpop.eup %1208  ;;  %v823_v61 = vrot.slane %v1515_v56, 4  ;;  %v962_v16 = vrot.slane %v955_v4, 4  ;;  %v963_v46 = vrot.slane %v956_v5, 4  ;;  %v964_v47 = vadd.f32 %v957_v10, %v950_v58 }
  0x3c   : > { %v1531_v1 = vpop.eup %1210  ;;  %v824_v2 = vrot.slane %v1522_v60, 4  ;;  %v829_v3 = vadd.f32 %v1505_v53, %v822_v57  ;;  %v965_v57 = vadd.f32 %v958_v11, %v951_v59  ;;  %v708_v10 = vshra.s32 %v1454_v39, 16 }
  0x3d   : > { %v1539_v7 = vpop.eup %1212  ;;  %v825_v8 = vrot.slane %v1531_v1, 4  ;;  %v830_v9 = vadd.f32 %v1515_v56, %v823_v61  ;;  %v966_v61 = vadd.f32 %v959_v28, %v952_v62  ;;  %v709_v62 = vshra.s32 %v1458_v18, 16 }
  0x3e   : > { %v1543_v12 = vpop.eup %1214  ;;  %v826_v19 = vrot.slane %v1539_v7, 4  ;;  %v831_v26 = vadd.f32 %v1522_v60, %v824_v2  ;;  %v836_v27 = vrot.slane %v829_v3, 6  ;;  %v967_v2 = vadd.f32 %v960_v33, %v953_v63 }
  0x3f   : > { %v1547_v29 = vpop.eup %1216  ;;  %v827_v30 = vrot.slane %v1543_v12, 4  ;;  %v832_v31 = vadd.f32 %v1531_v1, %v825_v8  ;;  %v837_v32 = vrot.slane %v830_v9, 6  ;;  %v969_v8 = vadd.f32 %v962_v16, %v955_v4 }
  0x40   : > { %v828_v23 = vrot.slane %v1547_v29, 4  ;;  %v833_v34 = vadd.f32 %v1539_v7, %v826_v19  ;;  %v838_v35 = vrot.slane %v831_v26, 6  ;;  %v1553_v36 = vadd.f32 %v836_v27, %v829_v3 }
  0x41   : > { %v834_v37 = vadd.f32 %v1543_v12, %v827_v30  ;;  %v839_v13 = vrot.slane %v832_v31, 6  ;;  %v844_v38 = vadd.f32 %v837_v32, %v830_v9  ;;  %v968_v3 = vadd.f32 %v961_v14, %v954_v0 }
  0x42   : > { %v835_v15 = vadd.f32 %v1547_v29, %v828_v23  ;;  %v840_v22 = vrot.slane %v833_v34, 6  ;;  %v845_v42 = vadd.f32 %v838_v35, %v831_v26  ;;  %1218 = vlog2.f32 %v1553_v36 }
  0x43   : > { %v841_v40 = vrot.slane %v834_v37, 6  ;;  %v846_v44 = vadd.f32 %v839_v13, %v832_v31  ;;  %1220 = vrcp.f32 %v844_v38  ;;  %v970_v9 = vadd.f32 %v963_v46, %v956_v5 }
  0x44   : > { %v1558_v45 = vadd.f32 %v840_v22, %v833_v34  ;;  %1222 = vrcp.f32 %v845_v42  ;;  %v842_v25 = vrot.slane %v835_v15, 6  ;;  %v971_v19 = vrot.slane %v964_v47, 6 }
  0x45   : > { %v1560_v48 = vadd.f32 %v841_v40, %v834_v37  ;;  %1224 = vrcp.f32 %v846_v44  ;;  %v972_v27 = vrot.slane %v965_v57, 6  ;;  %v973_v58 = vrot.slane %v966_v61, 6 }
  0x46   : > { %1226 = vrcp.f32 %v1558_v45  ;;  %v1564_v26 = vadd.f32 %v842_v25, %v835_v15  ;;  %v974_v59 = vrot.slane %v967_v2, 6  ;;  %v975_v11 = vrot.slane %v968_v3, 6 }
  0x47   : > { %1228 = vrcp.f32 %v1560_v48  ;;  %v976_v0 = vrot.slane %v969_v8, 6  ;;  %v977_v4 = vrot.slane %v970_v9, 6  ;;  %v978_v5 = vadd.f32 %v971_v19, %v964_v47 }
  0x48   : > { %1230 = vlog2.f32 %v844_v38  ;;  %v979_v30 = vadd.f32 %v972_v27, %v965_v57  ;;  %v980_v33 = vadd.f32 %v973_v58, %v966_v61  ;;  %v710_v39 = vshra.s32 %v1461_v21, 16 }
  0x49   : > { %1232 = vlog2.f32 %v845_v42  ;;  %v981_v18 = vadd.f32 %v974_v59, %v967_v2  ;;  %v1573_v35 = vcvt.s32.f32 %v708_v10  ;;  %v1575_v37 = vcvt.s32.f32 %v709_v62 }
  0x4a   : > { %1234 = vlog2.f32 %v846_v44  ;;  %v982_v14 = vadd.f32 %v975_v11, %v968_v3  ;;  %v983_v15 = vadd.f32 %v976_v0, %v969_v8  ;;  %v984_v22 = vadd.f32 %v977_v4, %v970_v9 }
  0x4b   : > { %1236 = vlog2.f32 %v1558_v45  ;;  %v711_v46 = vshra.s32 %v1465_v24, 16  ;;  %v933_v21 = vsel %vm1485_vm6, %v1573_v35, 0.0  ;;  %v1586_v61 = vcvt.s32.f32 %v710_v39 }
  0x4c   : > { %v1219_v63 = vpop.eup %1218  ;;  %1238 = vlog2.f32 %v1560_v48  ;;  %v713_v24 = vshra.s32 %v1472_v43, 16  ;;  %vm919_vm13 = vcmask 7168   ;;  %vm1037_vm14 = vcmask 0  }
  0x4d   : > { %v1221_v28 = vpop.eup %1220  ;;  %v986_v31 = vmul.f32 0.6931472, %v1219_v63  ;;  %1240 = vlog2.f32 %v1564_v26  ;;  %v935_v59 = vsel %vm1493_vm8, %v1586_v61, 0.0  ;;  %vm1052_vm15 = vcmask (%p1039_p6), 15368  }
  0x4e   : > { %v1223_v32 = vpop.eup %1222  ;;  %1242 = vrcp.f32 %v1553_v36  ;;  %v858_v23 = vmul.f32 %v1221_v28, %v844_v38  ;;  %v934_v38 = vsel %vm1489_vm7, %v1575_v37, 0.0  ;;  %vm1059_vm0 = vcmask (%p1039_p6), 23568  }
  0x4f   : > { %v1225_v34 = vpop.eup %1224  ;;  %1244 = vrcp.f32 %v1564_v26  ;;  %v999_v40 = vsub.f32 %v986_v31, %v978_v5  ;;  %v859_v47 = vmul.f32 %v1223_v32, %v845_v42  ;;  %v940_v11 = vadd.f32 %v934_v38, %v933_v21 }
  0x50   : > { %v1227_v13 = vpop.eup %1226  ;;  %v860_v2 = vmul.f32 %v1225_v34, %v846_v44  ;;  %v865_v3 = vsub.f32 2.0, %v858_v23 }
  0x51   : > { %v1229_v16 = vpop.eup %1228  ;;  %v861_v19 = vmul.f32 %v1227_v13, %v1558_v45  ;;  %v1013_v10 = vsel %vm677_vm2, %v999_v40, 0.0  ;;  %v866_v4 = vsub.f32 2.0, %v859_v47 }
  0x52   : > { %v1231_v25 = vpop.eup %1230  ;;  %v862_v0 = vmul.f32 %v1229_v16, %v1560_v48  ;;  %v867_v39 = vsub.f32 2.0, %v860_v2  ;;  %v872_v45 = vmul.f32 %v1221_v28, %v865_v3 }
  0x53   : > { %v1233_v8 = vpop.eup %1232  ;;  %v988_v9 = vmul.f32 0.6931472, %v1231_v25  ;;  %v868_v42 = vsub.f32 2.0, %v861_v19  ;;  %v873_v2 = vmul.f32 %v1223_v32, %v866_v4 }
  0x54   : > { %v1235_v27 = vpop.eup %1234  ;;  %v990_v58 = vmul.f32 0.6931472, %v1233_v8 }
  0x55   : > { %v1237_v62 = vpop.eup %1236  ;;  %v992_v44 = vmul.f32 0.6931472, %v1235_v27  ;;  %v1000_v63 = vsub.f32 %v988_v9, %v979_v30  ;;  %v869_v27 = vsub.f32 2.0, %v862_v0 }
  0x56   : > { %v1239_v43 = vpop.eup %1238  ;;  %v994_v5 = vmul.f32 0.6931472, %v1237_v62  ;;  %v1001_v31 = vsub.f32 %v990_v58, %v980_v33  ;;  %v874_v62 = vmul.f32 %v1225_v34, %v867_v39  ;;  %v941_v34 = vadd.f32 %v940_v11, %v935_v59 }
  0x57   : > { %v1241_v23 = vpop.eup %1240  ;;  %v996_v25 = vmul.f32 0.6931472, %v1239_v43  ;;  %v1002_v8 = vsub.f32 %v992_v44, %v981_v18  ;;  %v1014_v40 = vsel %vm677_vm2, %v1000_v63, 0.0  ;;  %v718_v44 = vcvt.s32.f32 %v711_v46 }
  0x58   : > { %v1243_v57 = vpop.eup %1242  ;;  %v998_v55 = vmul.f32 0.6931472, %v1241_v23  ;;  %v1003_v21 = vsub.f32 %v994_v5, %v982_v14  ;;  %v1015_v38 = vadd.f32 %v1014_v40, %v1013_v10  ;;  %v1016_v30 = vsel %vm677_vm2, %v1001_v31, 0.0 }
  0x59   : > { %v1245_v9 = vpop.eup %1244  ;;  %v1004_v48 = vsub.f32 %v996_v25, %v983_v15  ;;  %v1018_v47 = vsel %vm677_vm2, %v1002_v8, 0.0  ;;  %v857_v33 = vmul.f32 %v1243_v57, %v1553_v36  ;;  %v879_v14 = vmul.f32 %v1515_v56, %v872_v45 }
  0x5a   : > { %v1005_v28 = vsub.f32 %v998_v55, %v984_v22  ;;  %v1017_v3 = vadd.f32 %v1016_v30, %v1015_v38  ;;  %v863_v18 = vmul.f32 %v1245_v9, %v1564_v26  ;;  %v1020_v19 = vsel %vm677_vm2, %v1003_v21, 0.0 }
  0x5b   : > { %v864_v58 = vsub.f32 2.0, %v857_v33  ;;  %v875_v63 = vmul.f32 %v1227_v13, %v868_v42  ;;  %v1022_v36 = vsel %vm677_vm2, %v1004_v48, 0.0  ;;  %v880_v22 = vmul.f32 %v1522_v60, %v873_v2 }
  0x5c   : > { %v1012_v10 = vsel %vm744_vm3, %v1005_v28, 0.0  ;;  %v1019_v15 = vadd.f32 %v1018_v47, %v1017_v3  ;;  %v870_v32 = vsub.f32 2.0, %v863_v18  ;;  %v876_v0 = vmul.f32 %v1229_v16, %v869_v27 }
  0x5d   : > { %v871_v55 = vmul.f32 %v1243_v57, %v864_v58  ;;  %v936_v4 = vsel %vm1497_vm9, %v718_v44, 0.0  ;;  %v1024_v56 = vsel %vm677_vm2, %v1012_v10, 0.0  ;;  %v881_v5 = vmul.f32 %v1531_v1, %v874_v62 }
  0x5e   : > { %v1021_v26 = vadd.f32 %v1020_v19, %v1019_v15  ;;  %v896_v13 = vmul.f32 %v879_v14, %v1575_v37  ;;  %v1721_v42 = vshra.s32 %v1468_v41, 16  ;;  %v720_v31 = vcvt.s32.f32 %v713_v24 }
  0x5f   : > { %v878_v43 = vmul.f32 %v1505_v53, %v871_v55  ;;  %v882_v60 = vmul.f32 %v1539_v7, %v875_v63  ;;  %v877_v16 = vmul.f32 %v1245_v9, %v870_v32  ;;  %v897_v59 = vmul.f32 %v880_v22, %v1586_v61  ;;  %v921_v63 = vld [vmem:[#allocation3] sm:$0xff]  ;;  %v902_v32 = vld [vmem:[#allocation2] sm:$0xff]  ;;  %v1028_v55 = vld [vmem:[#allocation5] sm:$0x1] }
  0x60   : > { %v1023_v46 = vadd.f32 %v1022_v36, %v1021_v26  ;;  %v719_v57 = vcvt.s32.f32 %v1721_v42  ;;  %v904_v11 = vsel %vm1489_vm7, %v896_v13, 0.0  ;;  %v1722_v1 = vshra.s32 %v1475_v20, 16 }
  0x61   : > { %v895_v39 = vmul.f32 %v878_v43, %v1573_v35  ;;  %v883_v37 = vmul.f32 %v1543_v12, %v876_v0  ;;  %v942_v23 = vadd.f32 %v941_v34, %v936_v4  ;;  %v898_v41 = vmul.f32 %v881_v5, %v718_v44  ;;  %v932_v34 = vld [vmem:[#allocation4] sm:$0xff] }
  0x62   : > { %v1025_v53 = vadd.f32 %v1024_v56, %v1023_v46  ;;  %v721_v45 = vcvt.s32.f32 %v1722_v1  ;;  %v905_v35 = vsel %vm1493_vm8, %v897_v59, 0.0  ;;  %v937_v50 = vsel %vm1501_vm10, %v719_v57, 0.0 }
  0x63   : > { %v922_v25 = vadd.f32 %v896_v13, %v895_v39  ;;  %v903_v7 = vsel %vm1485_vm6, %v895_v39, 0.0  ;;  %v884_v24 = vmul.f32 %v1547_v29, %v877_v16  ;;  %v899_v20 = vmul.f32 %v882_v60, %v719_v57 }
  0x64   : > { %1026 = vadd.xlane.f32.xlu0 %v1025_v53  ;;  %v910_v61 = vadd.f32 %v904_v11, %v903_v7  ;;  %v906_v12 = vsel %vm1497_vm9, %v898_v41, 0.0  ;;  %v772_v40 = vsel %vm744_vm3, %v721_v45, 0.0  ;;  %v900_v21 = vmul.f32 %v883_v37, %v720_v31 }
  0x65   : > { %v923_v8 = vadd.f32 %v922_v25, %v897_v59  ;;  %v943_v6 = vadd.f32 %v942_v23, %v937_v50  ;;  %v907_v30 = vsel %vm1501_vm10, %v899_v20, 0.0  ;;  %v938_v9 = vsel %vm1507_vm11, %v720_v31, 0.0 }
  0x66   : > { %v911_v49 = vadd.f32 %v910_v61, %v905_v35  ;;  %v901_v29 = vmul.f32 %v884_v24, %v772_v40  ;;  %v908_v51 = vsel %vm1507_vm11, %v900_v21, 0.0  ;;  %v939_v52 = vsel %vm1511_vm12, %v772_v40, 0.0 }
  0x67   : > { %v924_v38 = vadd.f32 %v923_v8, %v898_v41  ;;  %v944_v2 = vadd.f32 %v943_v6, %v938_v9 }
  0x68   : > { %v912_v48 = vadd.f32 %v911_v49, %v906_v12  ;;  %v909_v3 = vsel %vm1511_vm12, %v901_v29, 0.0 }
  0x69   : > { %v925_v47 = vadd.f32 %v924_v38, %v899_v20  ;;  %v945_v58 = vadd.f32 %v944_v2, %v939_v52 }
  0x6a   : > { %v913_v33 = vadd.f32 %v912_v48, %v907_v30 }
  0x6b   : > { %v926_v17 = vadd.f32 %v925_v47, %v900_v21 }
  0x6c   : > { %v914_v18 = vadd.f32 %v913_v33, %v908_v51 }
  0x6d   : > { %v927_v27 = vadd.f32 %v926_v17, %v901_v29 }
  0x6e   : > { %v915_v19 = vadd.f32 %v914_v18, %v909_v3 }
  0x6f   : > { %928 = vadd.xlane.f32.xlu1 %v927_v27 }
  0x70   : > { %916 = vadd.xlane.f32.xlu0 %v915_v19 }
  0x73   : > { %946 = vadd.xlane.f32.xlu1 %v945_v58 }
  0xf1   : > { %v1027_v62 = vpop.xlane.xlu0 %1026 }
  0xf2   : > { %v1029_v54 = vsel %vm677_vm2, %v1027_v62, 0.0 }
  0xf3   : > { %v1030_v14 = vrot.slane %v1029_v54, 4 }
  0xf5   : > { %v1031_v10 = vadd.f32 %v1030_v14, %v1029_v54 }
  0xf7   : > { %v1032_v15 = vrot.slane %v1031_v10, 2 }
  0xf9   : > { %v1033_v44 = vadd.f32 %v1032_v15, %v1031_v10 }
  0xfb   : > { %v1034_v36 = vrot.slane %v1033_v44, 1 }
  0xfc   : > { %v929_v22 = vpop.xlane.xlu1 %928 }
  0xfd   : > { %v1035_v26 = vadd.f32 %v1034_v36, %v1033_v44  ;;  %v930_v0 = vadd.f32 %v929_v22, %v921_v63  ;;  %v917_v4 = vpop.xlane.xlu0 %916  ;;  %1043 = sbr.rel (!%p1039_p6) target bundleno = 383 (0x17f), region = 44 }
  0xfe   : > { %v918_v56 = vadd.f32 %v917_v4, %v902_v32 }
  0xff   : > { %v1036_v43 = vadd.f32 %v1035_v26, %v1028_v55  ;;  %931 = vst.msk [vmem:[#allocation3] sm:$0xff] %vm919_vm13, %v930_v0 }
 0x100   : > { %v947_v5 = vpop.xlane.xlu1 %946  ;;  %920 = vst.msk [vmem:[#allocation2] sm:$0xff] %vm919_vm13, %v918_v56 }
 0x101   : > { %1038 = vst.msk [vmem:[#allocation5] sm:$0x1] %vm1037_vm14, %v1036_v43  ;;  %v948_v13 = vadd.f32 %v947_v5, %v932_v34 }
 0x103   : > { %949 = vst.msk [vmem:[#allocation4] sm:$0xff] %vm919_vm13, %v948_v13 }
 0x106   : > { %v1047_v46 = vld [vmem:[#allocation3] sm:$0xff] }
 0x107   : > { %v1044_v42 = vld [vmem:[#allocation2] sm:$0xff]  ;;  %1049 = vrot.lane.b32.xlu0 %v1047_v46, %s1302_s26 }
 0x108   : > { %1046 = vst.msk [vmem:[%s1702_s2] sm:$0xff] %vm919_vm13, %v1044_v42  ;;  %v1061_v57 = vld [vmem:[#allocation5] sm:$0x1] }
 0x109   : > { %1063 = vst.msk [vmem:[#allocation6] sm:$0x1] %vm1037_vm14, %v1061_v57 }
 0x10a   : > { %v1054_v31 = vld [vmem:[#allocation4] sm:$0xff] }
 0x10b   : > { %1056 = vrot.lane.b32.xlu0 %v1054_v31, %s1303_s29 }
 0x179   : > { %v1050_v60 = vpop.permute.xlu0 %1049 }
 0x17a   : > { %1053 = vst.msk [vmem:[%s1702_s2] sm:$0xff] %vm1052_vm15, %v1050_v60 }
 0x17d   : > { %v1057_v16 = vpop.permute.xlu0 %1056 }
 0x17e   : > { %1060 = vst.msk [vmem:[%s1702_s2] sm:$0xff] %vm1059_vm0, %v1057_v16 }
 0x17f PF: > { %p1665_p7 = scmp.eq.s32.totalorder %s1149_s15, 1  ;;  %s1304_s8 = smov [#allocation6]  }
 0x180   : > { %s1074_s9 = sshll.u32 %s1304_s8, 4  ;;  %s1075_s9 = int_to_ptr.vmem [resolvable:$true] %s1074_s9 }
 0x181   : > { %s1246_s10 = scalar_lea.vmem %s1075_s9, 16  ;;  %s1252_s11 = scalar_lea.vmem %s1075_s9, 32 }
 0x182   : > { %p1247_p8 = scmp.ne.s32.totalorder %s1075_s9, %s1246_s10  ;;  %p1253_p11 = scmp.lt.s32.totalorder %s1075_s9, %s1075_s9 }
 0x183   : > { %p1254_p12 = scmp.lt.s32.totalorder %s1252_s11, %s1246_s10 }
 0x184   : > { %p1248_p9 = pnand %p1247_p8, %p1665_p7 }
 0x185   : > { %p1255_p13 = por %p1254_p12, %p1253_p11 }
 0x186   : > { %p1249_p10 = pneg %p1248_p9 }
 0x188   : > { %p1256_p0 = pnand %p1255_p13, %p1249_p10 }
 0x18a   : > { %1259 = shalt.err (!%p1256_p0)
}
 0x18b   : > { %s1260_s17 = scalar_lea.hbm %s1703_s3, 16 }
 0x18c   : > { %p1261_p1 = scmp.ne.s32.totalorder %s1703_s3, %s1260_s17  ;;  %p1266_p4 = scmp.lt.u32.totalorder %s1260_s17, %s1703_s3 }
 0x18e   : > { %p1262_p2 = pnand %p1261_p1, %p1665_p7 }
 0x190   : > { %p1263_p3 = pneg %p1262_p2 }
 0x192   : > { %p1268_p5 = pnand %p1266_p4, %p1263_p3 }
 0x194   : > { %1271 = shalt.err (!%p1268_p5)
}
 0x195   : > { %1166 = dma.vmem_to_hbm [thread:$0]  (%p1665_p7), %s1075_s9, 16, %s1703_s3, [#allocation7]  }
 0x196   : > { %1285 = dma.done.wait (%p1665_p7), [#allocation7], 16  }
 0x197   : > { %1287 = vsyncadd (%p1665_p7), [#allocation7], 4294967280 }
 0x198 PF: > { %s15_s14 = sadd.s32 1, %s1298_s14   ;;  %s1725_s12 = smov %s1294_s13 }
 0x199   : > { %p12_p6 = scmp.ge.s32.totalorder %s15_s14, 4   ;;  %s1726_s13 = smov %s1728_s16 }
 0x19b   :  { %14 = sbr.rel (!%p12_p6) target bundleno = 2 (0x2), region = 82 }
 0x1a2   :  { %1090 = vsyncpa [#allocation7], 1 }
 0x1a3   :  { %1092 = vsyncpa [#allocation7 + $0x1], 1 }

</bundles_post_ra>
